<compile_context>
chip_gen: v7x
topology: tpu7x:2x2x1
jax: 0.10.0
libtpu: 0.0.40
codegen_flags: <defaults>
</compile_context>

<pallas_src>
import jax
import jax.numpy as jnp
from jax.experimental import pallas as pl
from jax.experimental.pallas import tpu as pltpu

LANE = 128


def decoder_kernel(z_ref, w1_ref, b1_ref, w2_ref, b2_ref, out_ref):
    # z_ref  : (latent_dim, tm)      lane-dense batch tile (transposed input)
    # w1_ref : (nh_pad, latent_dim)  fc1 weight, PyTorch (out,in) layout, zero-padded rows
    # b1_ref : (nh_pad, 1)
    # w2_ref : (obs_dim, nh_pad)     fc2 weight, PyTorch (out,in) layout, zero-padded cols
    # b2_ref : (obs_dim, 1)
    # out_ref: (obs_dim, tm)         lane-dense output tile (transposed output)
    h = jnp.dot(w1_ref[...], z_ref[...],
                preferred_element_type=jnp.float32) + b1_ref[...]
    h = jnp.maximum(h, 0.0)                                     # ReLU (VPU)
    out = jnp.dot(w2_ref[...], h,
                  preferred_element_type=jnp.float32) + b2_ref[...]
    out_ref[...] = out.astype(out_ref.dtype)


def prepare_decoder_params(params):
    """One-time parameter prep (call once at init, not per forward).

    params are in PyTorch nn.Linear layout:
      w1: (nhidden, latent_dim), b1: (nhidden,)
      w2: (obs_dim, nhidden),    b2: (obs_dim,)
    Returns zero-padded, kernel-ready tensors (padding is exact: padded
    hidden rows give relu(0)=0 and multiply zero columns of w2).
    """
    w1, b1, w2, b2 = params
    nhidden, latent_dim = w1.shape
    obs_dim = w2.shape[0]
    nh_pad = pl.cdiv(nhidden, LANE) * LANE

    w1_p = jnp.zeros((nh_pad, latent_dim), jnp.float32).at[:nhidden, :].set(w1)
    b1_p = jnp.zeros((nh_pad, 1), jnp.float32).at[:nhidden, 0].set(b1)
    w2_p = jnp.zeros((obs_dim, nh_pad), jnp.float32).at[:, :nhidden].set(w2)
    b2_p = b2.reshape(obs_dim, 1).astype(jnp.float32)
    return (w1_p, b1_p, w2_p, b2_p)


def decoder_forward(z, prepared_params, *, tm=512):
    """Pallas equivalent of Decoder.forward.  z: (..., latent_dim)."""
    w1_p, b1_p, w2_p, b2_p = prepared_params
    nh_pad, latent_dim = w1_p.shape
    obs_dim = w2_p.shape[0]

    lead_shape = z.shape[:-1]
    z2 = z.reshape(-1, latent_dim).astype(jnp.float32)
    m = z2.shape[0]
    m_pad = pl.cdiv(m, tm) * tm

    # Transposed, lane-dense input; pad batch axis only when needed.
    z_t = z2.T                                        # (latent_dim, m)
    if m_pad != m:
        z_t = jnp.pad(z_t, ((0, 0), (0, m_pad - m)))  # (latent_dim, m_pad)

    grid = (m_pad // tm,)
    out_t = pl.pallas_call(
        decoder_kernel,
        out_shape=jax.ShapeDtypeStruct((obs_dim, m_pad), jnp.float32),
        grid_spec=pltpu.PrefetchScalarGridSpec(
            num_scalar_prefetch=0,
            grid=grid,
            in_specs=[
                pl.BlockSpec((latent_dim, tm), lambda i: (0, i)),      # z tile
                pl.BlockSpec((nh_pad, latent_dim), lambda i: (0, 0)),  # w1 (resident)
                pl.BlockSpec((nh_pad, 1), lambda i: (0, 0)),           # b1
                pl.BlockSpec((obs_dim, nh_pad), lambda i: (0, 0)),     # w2 (resident)
                pl.BlockSpec((obs_dim, 1), lambda i: (0, 0)),          # b2
            ],
            out_specs=pl.BlockSpec((obs_dim, tm), lambda i: (0, i)),
        ),
        compiler_params=pltpu.CompilerParams(
            dimension_semantics=("parallel",)),
    )(z_t, w1_p, b1_p, w2_p, b2_p)

    out = out_t[:, :m].T                              # (m, obs_dim), tiny copy
    return out.reshape(*lead_shape, obs_dim)


def init_params(key, latent_dim=4, obs_dim=2, nhidden=20):
    """Matches nn.Linear: weights (out_features, in_features), uniform(-1/sqrt(fan_in), ...)."""
    k1, k2, k3, k4 = jax.random.split(key, 4)
    b_fc1 = 1.0 / jnp.sqrt(float(latent_dim))
    b_fc2 = 1.0 / jnp.sqrt(float(nhidden))
    w1 = jax.random.uniform(k1, (nhidden, latent_dim), jnp.float32, -b_fc1, b_fc1)
    b1 = jax.random.uniform(k2, (nhidden,), jnp.float32, -b_fc1, b_fc1)
    w2 = jax.random.uniform(k3, (obs_dim, nhidden), jnp.float32, -b_fc2, b_fc2)
    b2 = jax.random.uniform(k4, (obs_dim,), jnp.float32, -b_fc2, b_fc2)
    return (w1, b1, w2, b2)


def reference_forward(z, params):
    w1, b1, w2, b2 = params
    h = jnp.maximum(z @ w1.T + b1, 0.0)
    return h @ w2.T + b2


if __name__ == "__main__":
    latent_dim, obs_dim, nhidden = 4, 2, 20
    T, B = 6, 5                      # small latent trajectory: (T, B, latent_dim)

    key = jax.random.PRNGKey(0)
    kz, kp = jax.random.split(key)
    z = jax.random.normal(kz, (T, B, latent_dim), jnp.float32)
    params = init_params(kp, latent_dim, obs_dim, nhidden)

    prepared = prepare_decoder_params(params)   # one-time prep, hoisted out of forward
    out = decoder_forward(z, prepared)
    out = jax.block_until_ready(out)

    out_ref = reference_forward(z, params)
    assert out.shape == (T, B, obs_dim)
    assert jnp.allclose(out, out_ref, atol=1e-5, rtol=1e-5)

    print("KERNEL_OK")
</pallas_src>

<mosaic_0001>
module attributes {stable_mosaic.version = 11 : i64} {
  func.func @decoder_kernel(%arg0: i32, %arg1: memref<4x512xf32, #tpu.memory_space<vmem>>, %arg2: memref<128x4xf32, #tpu.memory_space<vmem>>, %arg3: memref<128x1xf32, #tpu.memory_space<vmem>>, %arg4: memref<2x128xf32, #tpu.memory_space<vmem>>, %arg5: memref<2x1xf32, #tpu.memory_space<vmem>>, %arg6: memref<2x512xf32, #tpu.memory_space<vmem>>) attributes {dimension_semantics = [#tpu.dimension_semantics<parallel>], iteration_bounds = array<i64: 1>, scalar_prefetch = 0 : i64, scratch_operands = 0 : i64, tpu.core_type = #tpu.core_type<tc>, window_params = [{transform_indices = @transform_0, window_bounds = array<i64: 4, 512>}, {pipeline_mode = #tpu.pipeline_mode<synchronous>, transform_indices = @transform_1, window_bounds = array<i64: 128, 4>}, {pipeline_mode = #tpu.pipeline_mode<synchronous>, transform_indices = @transform_2, window_bounds = array<i64: 128, 1>}, {pipeline_mode = #tpu.pipeline_mode<synchronous>, transform_indices = @transform_3, window_bounds = array<i64: 2, 128>}, {pipeline_mode = #tpu.pipeline_mode<synchronous>, transform_indices = @transform_4, window_bounds = array<i64: 2, 1>}, {transform_indices = @transform_5, window_bounds = array<i64: 2, 512>}]} {
    %c0 = arith.constant 0 : index
    %c0_0 = arith.constant 0 : index
    %0 = vector.load %arg2[%c0, %c0_0] : memref<128x4xf32, #tpu.memory_space<vmem>>, vector<128x4xf32>
    %c0_1 = arith.constant 0 : index
    %c0_2 = arith.constant 0 : index
    %1 = vector.load %arg1[%c0_1, %c0_2] : memref<4x512xf32, #tpu.memory_space<vmem>>, vector<4x512xf32>
    %cst = arith.constant dense<0.000000e+00> : vector<128x512xf32>
    %2 = tpu.matmul %0, %1, %cst {dimension_numbers = #tpu.dot_dimension_numbers<[1], [0], [0], [1], [0, 0, 1, 1], [], []>} : vector<128x4xf32>, vector<4x512xf32>, vector<128x512xf32> -> vector<128x512xf32>
    %c0_3 = arith.constant 0 : index
    %c0_4 = arith.constant 0 : index
    %3 = vector.load %arg3[%c0_3, %c0_4] : memref<128x1xf32, #tpu.memory_space<vmem>>, vector<128x1xf32>
    %4 = vector.broadcast %3 : vector<128x1xf32> to vector<128x512xf32>
    %5 = arith.addf %2, %4 : vector<128x512xf32>
    %cst_5 = arith.constant 0.000000e+00 : f32
    %6 = vector.broadcast %cst_5 : f32 to vector<128x512xf32>
    %7 = arith.maximumf %5, %6 : vector<128x512xf32>
    %c0_6 = arith.constant 0 : index
    %c0_7 = arith.constant 0 : index
    %8 = vector.load %arg4[%c0_6, %c0_7] : memref<2x128xf32, #tpu.memory_space<vmem>>, vector<2x128xf32>
    %cst_8 = arith.constant dense<0.000000e+00> : vector<2x512xf32>
    %9 = tpu.matmul %8, %7, %cst_8 {dimension_numbers = #tpu.dot_dimension_numbers<[1], [0], [0], [1], [0, 0, 1, 1], [], []>} : vector<2x128xf32>, vector<128x512xf32>, vector<2x512xf32> -> vector<2x512xf32>
    %c0_9 = arith.constant 0 : index
    %c0_10 = arith.constant 0 : index
    %10 = vector.load %arg5[%c0_9, %c0_10] : memref<2x1xf32, #tpu.memory_space<vmem>>, vector<2x1xf32>
    %11 = vector.broadcast %10 : vector<2x1xf32> to vector<2x512xf32>
    %12 = arith.addf %9, %11 : vector<2x512xf32>
    %c0_11 = arith.constant 0 : index
    %c0_12 = arith.constant 0 : index
    %13 = vector.load %arg6[%c0_11, %c0_12] : memref<2x512xf32, #tpu.memory_space<vmem>>, vector<2x512xf32>
    tpu.vector_store %arg6[%c0_11, %c0_12], %12 {strides = array<i32>} : memref<2x512xf32, #tpu.memory_space<vmem>>, vector<2x512xf32>,
    return
  }
  func.func @transform_0(%arg0: i32) -> (i32, i32) {
    %c0_i32 = arith.constant 0 : i32
    %c0_i32_0 = arith.constant 0 : i32
    return %c0_i32, %arg0 : i32, i32
  }
  func.func @transform_1(%arg0: i32) -> (i32, i32) {
    %c0_i32 = arith.constant 0 : i32
    %c0_i32_0 = arith.constant 0 : i32
    %c0_i32_1 = arith.constant 0 : i32
    return %c0_i32, %c0_i32_0 : i32, i32
  }
  func.func @transform_2(%arg0: i32) -> (i32, i32) {
    %c0_i32 = arith.constant 0 : i32
    %c0_i32_0 = arith.constant 0 : i32
    %c0_i32_1 = arith.constant 0 : i32
    return %c0_i32, %c0_i32_0 : i32, i32
  }
  func.func @transform_3(%arg0: i32) -> (i32, i32) {
    %c0_i32 = arith.constant 0 : i32
    %c0_i32_0 = arith.constant 0 : i32
    %c0_i32_1 = arith.constant 0 : i32
    return %c0_i32, %c0_i32_0 : i32, i32
  }
  func.func @transform_4(%arg0: i32) -> (i32, i32) {
    %c0_i32 = arith.constant 0 : i32
    %c0_i32_0 = arith.constant 0 : i32
    %c0_i32_1 = arith.constant 0 : i32
    return %c0_i32, %c0_i32_0 : i32, i32
  }
  func.func @transform_5(%arg0: i32) -> (i32, i32) {
    %c0_i32 = arith.constant 0 : i32
    %c0_i32_0 = arith.constant 0 : i32
    return %c0_i32, %arg0 : i32, i32
  }
}

</mosaic_0001>

<bundles_post_ra>
// kernel: tpu_custom_call.1
= control target key start
LH: loop header
LB: loop body
LE: loop exit
PB: predicated region body
PF: predicated region fallthrough
CT: control target
= control target key end

     0   :  { %vm188_vm0 = vcmask 1043456   ;;  %v901_v4 = vmov 0.0   ;;  %vm139_vm1 = vcmask 31744   ;;  %v902_v6 = vmov 0   ;;  %s1121_s0 = inlined_call_operand.vmem [shape: f32[4,512], index: 0, kind: input, shape index: {}]   ;;  %s1122_s1 = inlined_call_operand.vmem [shape: f32[128,4], index: 1, kind: input, shape index: {}]   ;;  %s1123_s2 = inlined_call_operand.vmem [shape: f32[128,1], index: 2, kind: input, shape index: {}]   ;;  %s1124_s3 = inlined_call_operand.vmem [shape: f32[2,128], index: 3, kind: input, shape index: {}]   ;;  %s1125_s4 = inlined_call_operand.vmem [shape: f32[2,1], index: 4, kind: input, shape index: {}]   ;;  %s1126_s5 = inlined_call_operand.hbm [shape: f32[2,512], index: 5, kind: output, shape index: {}]  }
   0x1   :  { %v37_v0 = vld [vmem:[%s1121_s0] sm:$0xff]  ;;  %v38_v1 = vld [vmem:[%s1121_s0 + $0x8] sm:$0xff]  ;;  %261 = vmatprep.mubr.f32.mxu0 %v901_v4  ;;  %422 = vmatprep.mubr.f32.mxu1 %v901_v4  ;;  %v41_v9 = vld [vmem:[%s1123_s2 + $0x10] sm:$0xff] }
   0x2   :  { %v137_v2 = vcombine.high %v37_v0, %v37_v0  ;;  %v138_v3 = vcombine.high %v38_v1, %v38_v1  ;;  %v21_v5 = vld [vmem:[%s1122_s1] sm:$0xff]  ;;  %873 = vset.pattern.permute.xlu0 %v902_v6  ;;  %874 = vset.pattern.permute.xlu1 %v902_v6  ;;  %v22_v8 = vld [vmem:[%s1122_s1 + $0x8] sm:$0xff]  ;;  %v42_v11 = vld [vmem:[%s1123_s2 + $0x18] sm:$0xff] }
   0x3   :  { %v39_v7 = vld [vmem:[%s1123_s2] sm:$0xff]  ;;  %v40_v10 = vld [vmem:[%s1123_s2 + $0x8] sm:$0xff]  ;;  %67 = vperm.xlu1 %874, %v41_v9   ;;  %v23_v12 = vld [vmem:[%s1122_s1 + $0x10] sm:$0xff] }
   0x4   :  { %769 = vmatprep.subr.msk.mxu0 %vm188_vm0, %v137_v2  ;;  %787 = vmatprep.subr.msk.mxu1 %vm188_vm0, %v138_v3 }
   0x5   :  { %770 = vmatpush1.msk.msra.mxu0 %vm188_vm0, %v37_v0  ;;  %788 = vmatpush1.msk.msra.mxu1 %vm188_vm0, %v38_v1 }
   0x6   :  { %771 = vmatmul.mubr.msk.f32.vlgmr.msra.gmra.mrb[0].mxu0 %vm139_vm1, %v21_v5  ;;  %789 = vmatmul.mubr.msk.f32.vlgmr.msra.gmra.mrb[0].mxu1 %vm139_vm1, %v21_v5 }
   0x7   :  { %267 = vmatprep.mubr.f32.mxu0 %v901_v4  ;;  %428 = vmatprep.mubr.f32.mxu1 %v901_v4 }
   0x8   :  { %57 = vperm.xlu0 %873, %v39_v7  }
   0xa   :  { %772 = vmatmul.mubr.msk.f32.gmra.mrb[2].mxu0 %vm139_vm1, %v22_v8  ;;  %790 = vmatmul.mubr.msk.f32.gmra.mrb[2].mxu1 %vm139_vm1, %v22_v8 }
   0xb   :  { %273 = vmatprep.mubr.f32.mxu0 %v901_v4  ;;  %434 = vmatprep.mubr.f32.mxu1 %v901_v4 }
   0xc   :  { %62 = vperm.xlu0 %873, %v40_v10  }
   0xd   :  { %10 = vsyncpa [#allocation3], 0  ;;  %v43_v13 = vld [vmem:[%s1123_s2 + $0x20] sm:$0xff]  ;;  %72 = vperm.xlu1 %874, %v42_v11   ;;  %v44_v14 = vld [vmem:[%s1123_s2 + $0x28] sm:$0xff] }
   0xe   :  { %773 = vmatmul.mubr.msk.f32.gmra.mrb[4].mxu0 %vm139_vm1, %v23_v12  ;;  %791 = vmatmul.mubr.msk.f32.gmra.mrb[4].mxu1 %vm139_vm1, %v23_v12  ;;  %v24_v15 = vld [vmem:[%s1122_s1 + $0x18] sm:$0xff]  ;;  %v45_v16 = vld [vmem:[%s1123_s2 + $0x30] sm:$0xff]  ;;  %v25_v18 = vld [vmem:[%s1122_s1 + $0x20] sm:$0xff] }
   0xf   :  { %279 = vmatprep.mubr.f32.mxu0 %v901_v4  ;;  %440 = vmatprep.mubr.f32.mxu1 %v901_v4  ;;  %v46_v17 = vld [vmem:[%s1123_s2 + $0x38] sm:$0xff]  ;;  %v47_v19 = vld [vmem:[%s1123_s2 + $0x40] sm:$0xff]  ;;  %v48_v20 = vld [vmem:[%s1123_s2 + $0x48] sm:$0xff] }
  0x10   :  { %77 = vperm.xlu0 %873, %v43_v13   ;;  %v26_v21 = vld [vmem:[%s1122_s1 + $0x28] sm:$0xff]  ;;  %v49_v22 = vld [vmem:[%s1123_s2 + $0x50] sm:$0xff]  ;;  %v50_v23 = vld [vmem:[%s1123_s2 + $0x58] sm:$0xff] }
  0x11   :  { %82 = vperm.xlu1 %874, %v44_v14   ;;  %v27_v24 = vld [vmem:[%s1122_s1 + $0x30] sm:$0xff]  ;;  %v51_v25 = vld [vmem:[%s1123_s2 + $0x60] sm:$0xff]  ;;  %v52_v26 = vld [vmem:[%s1123_s2 + $0x68] sm:$0xff] }
  0x12   :  { %774 = vmatmul.mubr.msk.f32.gmra.mrb[6].mxu0 %vm139_vm1, %v24_v15  ;;  %792 = vmatmul.mubr.msk.f32.gmra.mrb[6].mxu1 %vm139_vm1, %v24_v15  ;;  %v28_v27 = vld [vmem:[%s1122_s1 + $0x38] sm:$0xff]  ;;  %v53_v28 = vld [vmem:[%s1123_s2 + $0x70] sm:$0xff]  ;;  %v29_v30 = vld [vmem:[%s1122_s1 + $0x40] sm:$0xff] }
  0x13   :  { %285 = vmatprep.mubr.f32.mxu0 %v901_v4  ;;  %446 = vmatprep.mubr.f32.mxu1 %v901_v4  ;;  %v54_v29 = vld [vmem:[%s1123_s2 + $0x78] sm:$0xff]  ;;  %v584_v31 = vld [vmem:[%s1125_s4] sm:$0x3]  ;;  %v30_v32 = vld [vmem:[%s1122_s1 + $0x48] sm:$0xff] }
  0x14   :  { %87 = vperm.xlu0 %873, %v45_v16   ;;  %v31_v33 = vld [vmem:[%s1122_s1 + $0x50] sm:$0xff]  ;;  %v32_v34 = vld [vmem:[%s1122_s1 + $0x58] sm:$0xff]  ;;  %v33_v35 = vld [vmem:[%s1122_s1 + $0x60] sm:$0xff] }
  0x15   :  { %92 = vperm.xlu1 %874, %v46_v17   ;;  %v34_v36 = vld [vmem:[%s1122_s1 + $0x68] sm:$0xff]  ;;  %v35_v37 = vld [vmem:[%s1122_s1 + $0x70] sm:$0xff]  ;;  %v36_v38 = vld [vmem:[%s1122_s1 + $0x78] sm:$0xff] }
  0x16   :  { %775 = vmatmul.mubr.msk.f32.gmra.mrb[8].mxu0 %vm139_vm1, %v25_v18  ;;  %793 = vmatmul.mubr.msk.f32.gmra.mrb[8].mxu1 %vm139_vm1, %v25_v18 }
  0x17   :  { %291 = vmatprep.mubr.f32.mxu0 %v901_v4  ;;  %452 = vmatprep.mubr.f32.mxu1 %v901_v4 }
  0x18   :  { %97 = vperm.xlu0 %873, %v47_v19  }
  0x19   :  { %102 = vperm.xlu1 %874, %v48_v20  }
  0x1a   :  { %776 = vmatmul.mubr.msk.f32.gmra.mrb[10].mxu0 %vm139_vm1, %v26_v21  ;;  %794 = vmatmul.mubr.msk.f32.gmra.mrb[10].mxu1 %vm139_vm1, %v26_v21 }
  0x1b   :  { %297 = vmatprep.mubr.f32.mxu0 %v901_v4  ;;  %458 = vmatprep.mubr.f32.mxu1 %v901_v4 }
  0x1c   :  { %107 = vperm.xlu0 %873, %v49_v22  }
  0x1d   :  { %112 = vperm.xlu1 %874, %v50_v23  }
  0x1e   :  { %777 = vmatmul.mubr.msk.f32.gmra.mrb[12].mxu0 %vm139_vm1, %v27_v24  ;;  %795 = vmatmul.mubr.msk.f32.gmra.mrb[12].mxu1 %vm139_vm1, %v27_v24 }
  0x1f   :  { %303 = vmatprep.mubr.f32.mxu0 %v901_v4  ;;  %464 = vmatprep.mubr.f32.mxu1 %v901_v4 }
  0x20   :  { %117 = vperm.xlu0 %873, %v51_v25  }
  0x21   :  { %122 = vperm.xlu1 %874, %v52_v26  }
  0x22   :  { %778 = vmatmul.mubr.msk.f32.gmra.mrb[14].mxu0 %vm139_vm1, %v28_v27  ;;  %796 = vmatmul.mubr.msk.f32.gmra.mrb[14].mxu1 %vm139_vm1, %v28_v27 }
  0x23   :  { %309 = vmatprep.mubr.f32.mxu0 %v901_v4  ;;  %470 = vmatprep.mubr.f32.mxu1 %v901_v4 }
  0x24   :  { %127 = vperm.xlu0 %873, %v53_v28  }
  0x25   :  { %132 = vperm.xlu1 %874, %v54_v29  }
  0x26   :  { %779 = vmatmul.mubr.msk.f32.gmra.mrb[16].mxu0 %vm139_vm1, %v29_v30  ;;  %797 = vmatmul.mubr.msk.f32.gmra.mrb[16].mxu1 %vm139_vm1, %v29_v30 }
  0x27   :  { %315 = vmatprep.mubr.f32.mxu0 %v901_v4  ;;  %476 = vmatprep.mubr.f32.mxu1 %v901_v4 }
  0x28   :  { %587 = vperm.xlu0 %873, %v584_v31  }
  0x2a   :  { %780 = vmatmul.mubr.msk.f32.gmra.mrb[18].mxu0 %vm139_vm1, %v30_v32  ;;  %798 = vmatmul.mubr.msk.f32.gmra.mrb[18].mxu1 %vm139_vm1, %v30_v32 }
  0x2b   :  { %321 = vmatprep.mubr.f32.mxu0 %v901_v4  ;;  %482 = vmatprep.mubr.f32.mxu1 %v901_v4 }
  0x2e   :  { %781 = vmatmul.mubr.msk.f32.gmra.mrb[20].mxu0 %vm139_vm1, %v31_v33  ;;  %799 = vmatmul.mubr.msk.f32.gmra.mrb[20].mxu1 %vm139_vm1, %v31_v33 }
  0x2f   :  { %327 = vmatprep.mubr.f32.mxu0 %v901_v4  ;;  %488 = vmatprep.mubr.f32.mxu1 %v901_v4 }
  0x32   :  { %782 = vmatmul.mubr.msk.f32.gmra.mrb[22].mxu0 %vm139_vm1, %v32_v34  ;;  %800 = vmatmul.mubr.msk.f32.gmra.mrb[22].mxu1 %vm139_vm1, %v32_v34 }
  0x33   :  { %333 = vmatprep.mubr.f32.mxu0 %v901_v4  ;;  %494 = vmatprep.mubr.f32.mxu1 %v901_v4 }
  0x36   :  { %783 = vmatmul.mubr.msk.f32.gmra.mrb[24].mxu0 %vm139_vm1, %v33_v35  ;;  %801 = vmatmul.mubr.msk.f32.gmra.mrb[24].mxu1 %vm139_vm1, %v33_v35 }
  0x37   :  { %339 = vmatprep.mubr.f32.mxu0 %v901_v4  ;;  %500 = vmatprep.mubr.f32.mxu1 %v901_v4 }
  0x3a   :  { %784 = vmatmul.mubr.msk.f32.gmra.mrb[26].mxu0 %vm139_vm1, %v34_v36  ;;  %802 = vmatmul.mubr.msk.f32.gmra.mrb[26].mxu1 %vm139_vm1, %v34_v36 }
  0x3b   :  { %345 = vmatprep.mubr.f32.mxu0 %v901_v4  ;;  %506 = vmatprep.mubr.f32.mxu1 %v901_v4 }
  0x3e   :  { %785 = vmatmul.mubr.msk.f32.gmra.mrb[28].mxu0 %vm139_vm1, %v35_v37  ;;  %803 = vmatmul.mubr.msk.f32.gmra.mrb[28].mxu1 %vm139_vm1, %v35_v37 }
  0x3f   :  { %351 = vmatprep.mubr.f32.mxu0 %v901_v4  ;;  %512 = vmatprep.mubr.f32.mxu1 %v901_v4 }
  0x42   :  { %786 = vmatmul.mubr.msk.f32.gmra.mrb[30].mxu0 %vm139_vm1, %v36_v38  ;;  %804 = vmatmul.mubr.msk.f32.gmra.mrb[30].mxu1 %vm139_vm1, %v36_v38 }
  0x43   :  { %654 = vmatprep.mubr.f32.mxu0 %v901_v4  ;;  %725 = vmatprep.mubr.f32.mxu1 %v901_v4 }
  0x82   :  { %v68_v45 = vpop.permute.xlu1 %67 }
  0x87   :  { %v58_v39 = vpop.permute.xlu0 %57 }
  0x8b   :  { %v63_v44 = vpop.permute.xlu0 %62 }
  0x8c   :  { %v73_v10 = vpop.permute.xlu1 %72 }
  0x8f   :  { %v78_v37 = vpop.permute.xlu0 %77 }
  0xd9   :  { %v263_v40 = vpop.f32.mrb[0].mxu0  ;;  %v424_v41 = vpop.f32.mrb[0].mxu1 }
  0xda   :  { %v265_v42 = vpop.f32.mrb[1].mxu0  ;;  %v426_v43 = vpop.f32.mrb[1].mxu1  ;;  %v264_v46 = vadd.f32 %v263_v40, %v58_v39  ;;  %v425_v47 = vadd.f32 %v424_v41, %v58_v39 }
  0xdb   :  { %v266_v48 = vadd.f32 %v265_v42, %v58_v39  ;;  %v427_v49 = vadd.f32 %v426_v43, %v58_v39  ;;  %v83_v40 = vpop.permute.xlu1 %82 }
  0xdc   :  { %v519_v58 = vmax.f32 %v264_v46, 0.0  ;;  %v521_v59 = vmax.f32 %v425_v47, 0.0 }
  0xdd   :  { %v269_v50 = vpop.f32.mrb[2].mxu0  ;;  %v430_v51 = vpop.f32.mrb[2].mxu1  ;;  %v520_v62 = vmax.f32 %v266_v48, 0.0  ;;  %v522_v63 = vmax.f32 %v427_v49, 0.0 }
  0xde   :  { %v270_v52 = vadd.f32 %v269_v50, %v63_v44  ;;  %v431_v53 = vadd.f32 %v430_v51, %v63_v44  ;;  %v271_v54 = vpop.f32.mrb[3].mxu0  ;;  %v432_v55 = vpop.f32.mrb[3].mxu1 }
  0xdf   :  { %v272_v56 = vadd.f32 %v271_v54, %v63_v44  ;;  %v433_v57 = vadd.f32 %v432_v55, %v63_v44 }
  0xe0   :  { %v523_v60 = vmax.f32 %v270_v52, 0.0  ;;  %v525_v61 = vmax.f32 %v431_v53, 0.0 }
  0xe1   :  { %v524_v0 = vmax.f32 %v272_v56, 0.0  ;;  %v526_v1 = vmax.f32 %v433_v57, 0.0  ;;  %v275_v2 = vpop.f32.mrb[4].mxu0  ;;  %v436_v3 = vpop.f32.mrb[4].mxu1 }
  0xe2   :  { %v807_v4 = vpack.c.bf16 %v523_v60, %v519_v58  ;;  %v839_v5 = vpack.c.bf16 %v525_v61, %v521_v59  ;;  %v277_v6 = vpop.f32.mrb[5].mxu0  ;;  %v438_v7 = vpop.f32.mrb[5].mxu1  ;;  %v276_v11 = vadd.f32 %v275_v2, %v68_v45  ;;  %v437_v12 = vadd.f32 %v436_v3, %v68_v45 }
  0xe3   :  { %v805_v8 = vpack.c.bf16 %v524_v0, %v520_v62  ;;  %v837_v9 = vpack.c.bf16 %v526_v1, %v522_v63  ;;  %v278_v13 = vadd.f32 %v277_v6, %v68_v45  ;;  %v439_v14 = vadd.f32 %v438_v7, %v68_v45  ;;  %v88_v3 = vpop.permute.xlu0 %87  ;;  %v93_v6 = vpop.permute.xlu1 %92 }
  0xe4   :  { %v527_v23 = vmax.f32 %v276_v11, 0.0  ;;  %v529_v24 = vmax.f32 %v437_v12, 0.0 }
  0xe5   :  { %v281_v15 = vpop.f32.mrb[6].mxu0  ;;  %v442_v16 = vpop.f32.mrb[6].mxu1  ;;  %806 = vmatprep.subr.bf16.mxu0 %v805_v8  ;;  %838 = vmatprep.subr.bf16.mxu1 %v837_v9  ;;  %v528_v27 = vmax.f32 %v278_v13, 0.0  ;;  %v530_v28 = vmax.f32 %v439_v14, 0.0 }
  0xe6   :  { %v282_v17 = vadd.f32 %v281_v15, %v73_v10  ;;  %v443_v18 = vadd.f32 %v442_v16, %v73_v10  ;;  %v283_v19 = vpop.f32.mrb[7].mxu0  ;;  %v444_v20 = vpop.f32.mrb[7].mxu1  ;;  %808 = vmatpush1.bf16.msra.mxu0 %v807_v4  ;;  %840 = vmatpush1.bf16.msra.mxu1 %v839_v5 }
  0xe7   :  { %v284_v21 = vadd.f32 %v283_v19, %v73_v10  ;;  %v445_v22 = vadd.f32 %v444_v20, %v73_v10 }
  0xe8   :  { %v531_v25 = vmax.f32 %v282_v17, 0.0  ;;  %v533_v26 = vmax.f32 %v443_v18, 0.0 }
  0xe9   :  { %v532_v29 = vmax.f32 %v284_v21, 0.0  ;;  %v534_v30 = vmax.f32 %v445_v22, 0.0  ;;  %v287_v31 = vpop.f32.mrb[8].mxu0  ;;  %v448_v32 = vpop.f32.mrb[8].mxu1 }
  0xea   :  { %v811_v33 = vpack.c.bf16 %v531_v25, %v527_v23  ;;  %v843_v34 = vpack.c.bf16 %v533_v26, %v529_v24  ;;  %v289_v35 = vpop.f32.mrb[9].mxu0  ;;  %v450_v36 = vpop.f32.mrb[9].mxu1  ;;  %v288_v41 = vadd.f32 %v287_v31, %v78_v37  ;;  %v449_v42 = vadd.f32 %v448_v32, %v78_v37 }
  0xeb   :  { %v809_v38 = vpack.c.bf16 %v532_v29, %v528_v27  ;;  %v841_v39 = vpack.c.bf16 %v534_v30, %v530_v28  ;;  %v290_v43 = vadd.f32 %v289_v35, %v78_v37  ;;  %v451_v44 = vadd.f32 %v450_v36, %v78_v37  ;;  %v103_v36 = vpop.permute.xlu1 %102 }
  0xec   :  { %v535_v53 = vmax.f32 %v288_v41, 0.0  ;;  %v537_v54 = vmax.f32 %v449_v42, 0.0 }
  0xed   :  { %v293_v45 = vpop.f32.mrb[10].mxu0  ;;  %v454_v46 = vpop.f32.mrb[10].mxu1  ;;  %810 = vmatprep.subr.bf16.mxu0 %v809_v38  ;;  %842 = vmatprep.subr.bf16.mxu1 %v841_v39  ;;  %v536_v57 = vmax.f32 %v290_v43, 0.0  ;;  %v538_v58 = vmax.f32 %v451_v44, 0.0 }
  0xee   :  { %v294_v47 = vadd.f32 %v293_v45, %v83_v40  ;;  %v455_v48 = vadd.f32 %v454_v46, %v83_v40  ;;  %v295_v49 = vpop.f32.mrb[11].mxu0  ;;  %v456_v50 = vpop.f32.mrb[11].mxu1  ;;  %812 = vmatpush1.bf16.msra.mxu0 %v811_v33  ;;  %844 = vmatpush1.bf16.msra.mxu1 %v843_v34 }
  0xef   :  { %v296_v51 = vadd.f32 %v295_v49, %v83_v40  ;;  %v457_v52 = vadd.f32 %v456_v50, %v83_v40  ;;  %v98_v33 = vpop.permute.xlu0 %97 }
  0xf0   :  { %v539_v55 = vmax.f32 %v294_v47, 0.0  ;;  %v541_v56 = vmax.f32 %v455_v48, 0.0 }
  0xf1   :  { %v540_v59 = vmax.f32 %v296_v51, 0.0  ;;  %v542_v60 = vmax.f32 %v457_v52, 0.0  ;;  %v299_v61 = vpop.f32.mrb[12].mxu0  ;;  %v460_v62 = vpop.f32.mrb[12].mxu1 }
  0xf2   :  { %v815_v63 = vpack.c.bf16 %v539_v55, %v535_v53  ;;  %v847_v0 = vpack.c.bf16 %v541_v56, %v537_v54  ;;  %v301_v1 = vpop.f32.mrb[13].mxu0  ;;  %v462_v2 = vpop.f32.mrb[13].mxu1  ;;  %v300_v7 = vadd.f32 %v299_v61, %v88_v3  ;;  %v461_v8 = vadd.f32 %v460_v62, %v88_v3 }
  0xf3   :  { %v813_v4 = vpack.c.bf16 %v540_v59, %v536_v57  ;;  %v845_v5 = vpack.c.bf16 %v542_v60, %v538_v58  ;;  %v302_v9 = vadd.f32 %v301_v1, %v88_v3  ;;  %v463_v10 = vadd.f32 %v462_v2, %v88_v3  ;;  %v113_v2 = vpop.permute.xlu1 %112 }
  0xf4   :  { %v543_v19 = vmax.f32 %v300_v7, 0.0  ;;  %v545_v20 = vmax.f32 %v461_v8, 0.0 }
  0xf5   :  { %v305_v11 = vpop.f32.mrb[14].mxu0  ;;  %v466_v12 = vpop.f32.mrb[14].mxu1  ;;  %814 = vmatprep.subr.bf16.mxu0 %v813_v4  ;;  %846 = vmatprep.subr.bf16.mxu1 %v845_v5  ;;  %v544_v23 = vmax.f32 %v302_v9, 0.0  ;;  %v546_v24 = vmax.f32 %v463_v10, 0.0 }
  0xf6   :  { %v306_v13 = vadd.f32 %v305_v11, %v93_v6  ;;  %v467_v14 = vadd.f32 %v466_v12, %v93_v6  ;;  %v307_v15 = vpop.f32.mrb[15].mxu0  ;;  %v468_v16 = vpop.f32.mrb[15].mxu1  ;;  %816 = vmatpush1.bf16.msra.mxu0 %v815_v63  ;;  %848 = vmatpush1.bf16.msra.mxu1 %v847_v0 }
  0xf7   :  { %v308_v17 = vadd.f32 %v307_v15, %v93_v6  ;;  %v469_v18 = vadd.f32 %v468_v16, %v93_v6  ;;  %v108_v63 = vpop.permute.xlu0 %107 }
  0xf8   :  { %v547_v21 = vmax.f32 %v306_v13, 0.0  ;;  %v549_v22 = vmax.f32 %v467_v14, 0.0 }
  0xf9   :  { %v548_v25 = vmax.f32 %v308_v17, 0.0  ;;  %v550_v26 = vmax.f32 %v469_v18, 0.0  ;;  %v311_v27 = vpop.f32.mrb[16].mxu0  ;;  %v472_v28 = vpop.f32.mrb[16].mxu1 }
  0xfa   :  { %v819_v29 = vpack.c.bf16 %v547_v21, %v543_v19  ;;  %v851_v30 = vpack.c.bf16 %v549_v22, %v545_v20  ;;  %v313_v31 = vpop.f32.mrb[17].mxu0  ;;  %v474_v32 = vpop.f32.mrb[17].mxu1  ;;  %v312_v37 = vadd.f32 %v311_v27, %v98_v33  ;;  %v473_v38 = vadd.f32 %v472_v28, %v98_v33 }
  0xfb   :  { %v817_v34 = vpack.c.bf16 %v548_v25, %v544_v23  ;;  %v849_v35 = vpack.c.bf16 %v550_v26, %v546_v24  ;;  %v314_v39 = vadd.f32 %v313_v31, %v98_v33  ;;  %v475_v40 = vadd.f32 %v474_v32, %v98_v33  ;;  %v123_v32 = vpop.permute.xlu1 %122 }
  0xfc   :  { %v551_v49 = vmax.f32 %v312_v37, 0.0  ;;  %v553_v50 = vmax.f32 %v473_v38, 0.0 }
  0xfd   :  { %v317_v41 = vpop.f32.mrb[18].mxu0  ;;  %v478_v42 = vpop.f32.mrb[18].mxu1  ;;  %818 = vmatprep.subr.bf16.mxu0 %v817_v34  ;;  %850 = vmatprep.subr.bf16.mxu1 %v849_v35  ;;  %v552_v53 = vmax.f32 %v314_v39, 0.0  ;;  %v554_v54 = vmax.f32 %v475_v40, 0.0 }
  0xfe   :  { %v318_v43 = vadd.f32 %v317_v41, %v103_v36  ;;  %v479_v44 = vadd.f32 %v478_v42, %v103_v36  ;;  %v319_v45 = vpop.f32.mrb[19].mxu0  ;;  %v480_v46 = vpop.f32.mrb[19].mxu1  ;;  %820 = vmatpush1.bf16.msra.mxu0 %v819_v29  ;;  %852 = vmatpush1.bf16.msra.mxu1 %v851_v30 }
  0xff   :  { %v320_v47 = vadd.f32 %v319_v45, %v103_v36  ;;  %v481_v48 = vadd.f32 %v480_v46, %v103_v36  ;;  %v118_v29 = vpop.permute.xlu0 %117 }
 0x100   :  { %v555_v51 = vmax.f32 %v318_v43, 0.0  ;;  %v557_v52 = vmax.f32 %v479_v44, 0.0 }
 0x101   :  { %v556_v55 = vmax.f32 %v320_v47, 0.0  ;;  %v558_v56 = vmax.f32 %v481_v48, 0.0  ;;  %v323_v57 = vpop.f32.mrb[20].mxu0  ;;  %v484_v58 = vpop.f32.mrb[20].mxu1 }
 0x102   :  { %v823_v59 = vpack.c.bf16 %v555_v51, %v551_v49  ;;  %v855_v60 = vpack.c.bf16 %v557_v52, %v553_v50  ;;  %v325_v61 = vpop.f32.mrb[21].mxu0  ;;  %v486_v62 = vpop.f32.mrb[21].mxu1  ;;  %v324_v3 = vadd.f32 %v323_v57, %v108_v63  ;;  %v485_v4 = vadd.f32 %v484_v58, %v108_v63 }
 0x103   :  { %v821_v0 = vpack.c.bf16 %v556_v55, %v552_v53  ;;  %v853_v1 = vpack.c.bf16 %v558_v56, %v554_v54  ;;  %v326_v5 = vadd.f32 %v325_v61, %v108_v63  ;;  %v487_v6 = vadd.f32 %v486_v62, %v108_v63  ;;  %v133_v62 = vpop.permute.xlu1 %132 }
 0x104   :  { %v559_v15 = vmax.f32 %v324_v3, 0.0  ;;  %v561_v16 = vmax.f32 %v485_v4, 0.0 }
 0x105   :  { %v329_v7 = vpop.f32.mrb[22].mxu0  ;;  %v490_v8 = vpop.f32.mrb[22].mxu1  ;;  %822 = vmatprep.subr.bf16.mxu0 %v821_v0  ;;  %854 = vmatprep.subr.bf16.mxu1 %v853_v1  ;;  %v560_v19 = vmax.f32 %v326_v5, 0.0  ;;  %v562_v20 = vmax.f32 %v487_v6, 0.0 }
 0x106   :  { %v330_v9 = vadd.f32 %v329_v7, %v113_v2  ;;  %v491_v10 = vadd.f32 %v490_v8, %v113_v2  ;;  %v331_v11 = vpop.f32.mrb[23].mxu0  ;;  %v492_v12 = vpop.f32.mrb[23].mxu1  ;;  %824 = vmatpush1.bf16.msra.mxu0 %v823_v59  ;;  %856 = vmatpush1.bf16.msra.mxu1 %v855_v60 }
 0x107   :  { %v332_v13 = vadd.f32 %v331_v11, %v113_v2  ;;  %v493_v14 = vadd.f32 %v492_v12, %v113_v2  ;;  %v128_v59 = vpop.permute.xlu0 %127 }
 0x108   :  { %v563_v17 = vmax.f32 %v330_v9, 0.0  ;;  %v565_v18 = vmax.f32 %v491_v10, 0.0 }
 0x109   :  { %v564_v21 = vmax.f32 %v332_v13, 0.0  ;;  %v566_v22 = vmax.f32 %v493_v14, 0.0  ;;  %v335_v23 = vpop.f32.mrb[24].mxu0  ;;  %v496_v24 = vpop.f32.mrb[24].mxu1 }
 0x10a   :  { %v827_v25 = vpack.c.bf16 %v563_v17, %v559_v15  ;;  %v859_v26 = vpack.c.bf16 %v565_v18, %v561_v16  ;;  %v337_v27 = vpop.f32.mrb[25].mxu0  ;;  %v498_v28 = vpop.f32.mrb[25].mxu1  ;;  %v336_v33 = vadd.f32 %v335_v23, %v118_v29  ;;  %v497_v34 = vadd.f32 %v496_v24, %v118_v29  ;;  %v583_v23 = vld [vmem:[%s1124_s3] sm:$0x3]  ;;  %s904_s3 = smov [#allocation2]  }
 0x10b   :  { %v825_v30 = vpack.c.bf16 %v564_v21, %v560_v19  ;;  %v857_v31 = vpack.c.bf16 %v566_v22, %v562_v20  ;;  %v338_v35 = vadd.f32 %v337_v27, %v118_v29  ;;  %v499_v36 = vadd.f32 %v498_v28, %v118_v29  ;;  %v588_v29 = vpop.permute.xlu0 %587  ;;  %s761_s9 = sshll.u32 %s904_s3, 4  ;;  %s762_s9 = int_to_ptr.vmem [resolvable:$true] %s761_s9 }
 0x10c   :  { %v567_v45 = vmax.f32 %v336_v33, 0.0  ;;  %v569_v46 = vmax.f32 %v497_v34, 0.0  ;;  %v903_v24 = vmov 1983009808   ;;  %s877_s10 = scalar_lea.vmem %s762_s9, 128  ;;  %p882_p1 = scmp.lt.s32.totalorder %s762_s9, %s762_s9 }
 0x10d   :  { %v341_v37 = vpop.f32.mrb[26].mxu0  ;;  %v502_v38 = vpop.f32.mrb[26].mxu1  ;;  %826 = vmatprep.subr.bf16.mxu0 %v825_v30  ;;  %858 = vmatprep.subr.bf16.mxu1 %v857_v31  ;;  %v568_v49 = vmax.f32 %v338_v35, 0.0  ;;  %v570_v50 = vmax.f32 %v499_v36, 0.0  ;;  %p878_p0 = scmp.ne.s32.totalorder %s762_s9, %s877_s10  ;;  %p883_p2 = scmp.lt.s32.totalorder %s877_s10, %s877_s10 }
 0x10e   :  { %v342_v39 = vadd.f32 %v341_v37, %v123_v32  ;;  %v503_v40 = vadd.f32 %v502_v38, %v123_v32  ;;  %v343_v41 = vpop.f32.mrb[27].mxu0  ;;  %v504_v42 = vpop.f32.mrb[27].mxu1  ;;  %828 = vmatpush1.bf16.msra.mxu0 %v827_v25  ;;  %860 = vmatpush1.bf16.msra.mxu1 %v859_v26  ;;  %v739_v25 = vunpack.c.l.s4 %v903_v24  ;;  %v741_v26 = vlaneseq }
 0x10f   :  { %v344_v43 = vadd.f32 %v343_v41, %v123_v32  ;;  %v505_v44 = vadd.f32 %v504_v42, %v123_v32  ;;  %p884_p3 = por %p883_p2, %p882_p1 }
 0x110   :  { %v571_v47 = vmax.f32 %v342_v39, 0.0  ;;  %v573_v48 = vmax.f32 %v503_v40, 0.0  ;;  %v740_v27 = vunpack.c.0.s8 %v739_v25  ;;  %v742_v28 = vshrl.u32 %v741_v26, 7 }
 0x111   :  { %v572_v51 = vmax.f32 %v344_v43, 0.0  ;;  %v574_v52 = vmax.f32 %v505_v44, 0.0  ;;  %v347_v53 = vpop.f32.mrb[28].mxu0  ;;  %v508_v54 = vpop.f32.mrb[28].mxu1  ;;  %p885_p4 = pnand %p884_p3, %p878_p0 }
 0x112   :  { %v831_v55 = vpack.c.bf16 %v571_v47, %v567_v45  ;;  %v863_v56 = vpack.c.bf16 %v573_v48, %v569_v46  ;;  %v349_v57 = vpop.f32.mrb[29].mxu0  ;;  %v510_v58 = vpop.f32.mrb[29].mxu1  ;;  %v348_v63 = vadd.f32 %v347_v53, %v128_v59  ;;  %v509_v0 = vadd.f32 %v508_v54, %v128_v59 }
 0x113   :  { %v829_v60 = vpack.c.bf16 %v572_v51, %v568_v49  ;;  %v861_v61 = vpack.c.bf16 %v574_v52, %v570_v50  ;;  %v350_v1 = vadd.f32 %v349_v57, %v128_v59  ;;  %v511_v2 = vadd.f32 %v510_v58, %v128_v59 }
 0x114   :  { %v575_v11 = vmax.f32 %v348_v63, 0.0  ;;  %v577_v12 = vmax.f32 %v509_v0, 0.0  ;;  %v743_v38 = vsub.s32 %v740_v27, %v742_v28 }
 0x115   :  { %v353_v3 = vpop.f32.mrb[30].mxu0  ;;  %v514_v4 = vpop.f32.mrb[30].mxu1  ;;  %830 = vmatprep.subr.bf16.mxu0 %v829_v60  ;;  %862 = vmatprep.subr.bf16.mxu1 %v861_v61  ;;  %v576_v15 = vmax.f32 %v350_v1, 0.0  ;;  %v578_v16 = vmax.f32 %v511_v2, 0.0 }
 0x116   :  { %v354_v5 = vadd.f32 %v353_v3, %v133_v62  ;;  %v515_v6 = vadd.f32 %v514_v4, %v133_v62  ;;  %v355_v7 = vpop.f32.mrb[31].mxu0  ;;  %v516_v8 = vpop.f32.mrb[31].mxu1  ;;  %832 = vmatpush1.bf16.msra.mxu0 %v831_v55  ;;  %864 = vmatpush1.bf16.msra.mxu1 %v863_v56 }
 0x117   :  { %v356_v9 = vadd.f32 %v355_v7, %v133_v62  ;;  %v517_v10 = vadd.f32 %v516_v8, %v133_v62 }
 0x118   :  { %v579_v13 = vmax.f32 %v354_v5, 0.0  ;;  %v581_v14 = vmax.f32 %v515_v6, 0.0 }
 0x119   :  { %v580_v17 = vmax.f32 %v356_v9, 0.0  ;;  %v582_v18 = vmax.f32 %v517_v10, 0.0 }
 0x11a   :  { %v835_v19 = vpack.c.bf16 %v579_v13, %v575_v11  ;;  %v867_v20 = vpack.c.bf16 %v581_v14, %v577_v12 }
 0x11b   :  { %v833_v21 = vpack.c.bf16 %v580_v17, %v576_v15  ;;  %v865_v22 = vpack.c.bf16 %v582_v18, %v578_v16 }
 0x11d   :  { %834 = vmatprep.subr.bf16.mxu0 %v833_v21  ;;  %866 = vmatprep.subr.bf16.mxu1 %v865_v22 }
 0x11e   :  { %836 = vmatpush1.bf16.msra.mxu0 %v835_v19  ;;  %868 = vmatpush1.bf16.msra.mxu1 %v867_v20 }
 0x121   :  { %655 = vmatmul.mubr.f32.vlgmr.msra.gmra.mrb[32].mxu0 %v583_v23  ;;  %726 = vmatmul.mubr.f32.vlgmr.msra.gmra.mrb[32].mxu1 %v583_v23 }
 0x1f4   :  { %v656_v30 = vpop.f32.mrb[32].mxu0  ;;  %v727_v31 = vpop.f32.mrb[32].mxu1 }
 0x1f5   :  { %v657_v32 = vadd.f32 %v656_v30, %v588_v29  ;;  %v728_v33 = vadd.f32 %v727_v31, %v588_v29  ;;  %v658_v34 = vpop.f32.mrb[33].mxu0  ;;  %v729_v35 = vpop.f32.mrb[33].mxu1 }
 0x1f6   :  { %v659_v36 = vadd.f32 %v658_v34, %v588_v29  ;;  %v730_v37 = vadd.f32 %v729_v35, %v588_v29 }
 0x1f8   :  { %v736_v39 = vcombine.low %v657_v32, %v659_v36  ;;  %v737_v40 = vcombine.low %v728_v33, %v730_v37 }
 0x1fa   :  { %v744_v41 = vrot.slane %v736_v39, %v743_v38  ;;  %v751_v42 = vrot.slane %v737_v40, %v743_v38 }
 0x1fc   :  { %v752_v43 = vcombine.low %v744_v41, %v751_v42 }
 0x1fe   :  { %754 = vst [vmem:[#allocation2] sm:$0xff] %v752_v43 }
 0x1ff   :  { %888 = shalt.err (!%p885_p4)
}
 0x200   :  { %s889_s13 = scalar_lea.hbm %s1126_s5, 128 }
 0x201   :  { %p890_p5 = scmp.ne.s32.totalorder %s1126_s5, %s889_s13  ;;  %p893_p6 = scmp.lt.u32.totalorder %s889_s13, %s1126_s5 }
 0x203   :  { %p895_p7 = pnand %p893_p6, %p890_p5 }
 0x205   :  { %898 = shalt.err (!%p895_p7)
}
 0x206   :  { %764 = dma.vmem_to_hbm [thread:$0]  %s762_s9, 128, %s1126_s5, [#allocation3]  }
 0x207   :  { %899 = dma.done.wait [#allocation3], 128  }
 0x208   :  { %900 = vsyncadd [#allocation3], 4294967168 }
 0x209   :  { %768 = vsyncpa [#allocation3], 1 }

</bundles_post_ra>
